<compile_context>
chip_gen: v5e
topology: v5e:2x2
jax: 0.10.0
libtpu: 0.0.40
codegen_flags: <defaults>
</compile_context>

<pallas_src>
import jax
import jax.numpy as jnp
from jax.experimental import pallas as pl
from jax.experimental.pallas import tpu as pltpu

PACK = 8  # batch rows packed per lane-dense row (8 * D_in=16 -> 128 lanes)


def _round_up(n, m):
    return ((n + m - 1) // m) * m


def _mlp_kernel(x_ref,                        # (RB, PACK*D0)  packed batch rows
                w1_ref, b1_ref, hb1_ref,      # (PACK*D0, PACK*D1), (1, PACK*D1) x2
                w2_ref, b2_ref, hb2_ref,      # (PACK*D1, PACK*D2), (1, PACK*D2) x2
                w3_ref, b3_ref,               # (PACK*D2, PACK*D3), (1, PACK*D3)
                o_ref):                       # (RB, PACK*D3)
    x = x_ref[...]
    if x.dtype != w1_ref.dtype:
        x = x.astype(w1_ref.dtype)            # bf16 MXU operands, f32 accumulate

    # Layer 1: Linear + Swish (tanh form).  Block-diagonal weights keep the
    # 8 packed batch rows independent, so this is exactly 8 parallel MLPs.
    h = jnp.dot(x, w1_ref[...], preferred_element_type=jnp.float32) + b1_ref[...]
    h = h * (0.5 * (jnp.tanh(h * hb1_ref[...]) + 1.0))

    # Layer 2: Linear + Swish.
    h = jnp.dot(h.astype(w2_ref.dtype), w2_ref[...],
                preferred_element_type=jnp.float32) + b2_ref[...]
    h = h * (0.5 * (jnp.tanh(h * hb2_ref[...]) + 1.0))

    # Final Linear (no nonlinearity).
    o_ref[...] = (jnp.dot(h.astype(w3_ref.dtype), w3_ref[...],
                          preferred_element_type=jnp.float32)
                  + b3_ref[...]).astype(o_ref.dtype)


def _pack_params(params, use_bf16):
    """Expand PyTorch-layout params into the row-packed (block-diagonal) form."""
    wdt = jnp.bfloat16 if use_bf16 else jnp.float32
    eye = jnp.eye(PACK, dtype=jnp.float32)

    def bd(w):  # (out, in) torch layout -> (PACK*in, PACK*out) block-diag of w.T
        return jnp.kron(eye, w.T).astype(wdt)

    def rowvec(v, scale=1.0):  # (out,) -> (1, PACK*out), repeated per packed row
        return (scale * jnp.tile(jnp.reshape(v, (-1,)), PACK)).reshape(1, -1) \
            .astype(jnp.float32)

    return (
        bd(params["w1"]), rowvec(params["b1"]), rowvec(params["beta1"], 0.5),
        bd(params["w2"]), rowvec(params["b2"]), rowvec(params["beta2"], 0.5),
        bd(params["w3"]), rowvec(params["b3"]),
    )


def mlp_forward(x, params, *, block_b=8192, use_bf16=True):
    """x: (B, D_in) float32 -> (B, D_out) float32.

    params: PyTorch-layout weights (out, in); biases / Swish betas as (out,).
    """
    B, D0 = x.shape
    D1 = params["w1"].shape[0]
    D2 = params["w2"].shape[0]
    D3 = params["w3"].shape[0]
    assert params["w1"].shape[1] == D0

    # Pad batch only to a multiple of PACK (needed for the free packed
    # reshape). Usually a no-op; padded rows are never written back.
    b_pad = _round_up(max(B, 1), PACK)
    if b_pad != B:
        x = jnp.pad(x, ((0, b_pad - B), (0, 0)))
    rows = b_pad // PACK
    lane_in = PACK * D0            # 128 for D0=16
    lane_out = PACK * D3           # 64  for D3=8

    # Free bitcast: 8 consecutive batch rows per lane-dense packed row.
    x_packed = jnp.reshape(x, (rows, lane_in))

    # Packed-rows-per-step: big to amortize per-step overhead, multiple of 8
    # (sublane constraint), capped so the grid keeps >= 2 steps when possible
    # so both v7x TensorCores get work.
    desired_rb = max(8, (block_b // PACK) // 8 * 8)
    rb = min(desired_rb, _round_up(pl.cdiv(rows, 2), 8))
    rb = max(8, rb)
    rb = min(rb, rows)
    grid_b = pl.cdiv(rows, rb)

    param_args = _pack_params(params, use_bf16)

    def param_spec(a):
        zeros = (0,) * a.ndim
        # Tiny parameter, resident in VMEM across all grid steps.
        return pl.BlockSpec(a.shape, lambda i: zeros)

    cost = pl.CostEstimate(
        flops=2 * b_pad * (D0 * D1 + D1 * D2 + D2 * D3),
        transcendentals=b_pad * (D1 + D2),                 # one tanh / hidden elem
        bytes_accessed=4 * b_pad * (D0 + D3)
        + sum(int(a.size) * a.dtype.itemsize for a in param_args),
    )

    out_packed = pl.pallas_call(
        _mlp_kernel,
        out_shape=jax.ShapeDtypeStruct((rows, lane_out), jnp.float32),
        grid=(grid_b,),
        in_specs=[pl.BlockSpec((rb, lane_in), lambda i: (i, 0))]
        + [param_spec(a) for a in param_args],
        out_specs=pl.BlockSpec((rb, lane_out), lambda i: (i, 0)),
        compiler_params=pltpu.CompilerParams(
            dimension_semantics=("parallel",)),
        cost_estimate=cost,
    )(x_packed, *param_args)

    out = jnp.reshape(out_packed, (b_pad, D3))             # free bitcast
    return out[:B] if b_pad != B else out


def init_params(key, layers):
    """Deterministic synthetic init matching the module's parameter shapes.

    layers = [16, 32, 32, 8] -> Linear(16,32), Swish(32), Linear(32,32),
    Swish(32), Linear(32,8).  Weights stored PyTorch-style (out, in); biases
    and Swish betas stored as (out,) vectors.  Swish beta init = ones.
    """
    k = jax.random.split(key, 6)
    d0, d1, d2, d3 = layers
    scale = 0.1
    return {
        "w1": scale * jax.random.normal(k[0], (d1, d0), jnp.float32),
        "b1": scale * jax.random.normal(k[1], (d1,), jnp.float32),
        "beta1": jnp.ones((d1,), jnp.float32),
        "w2": scale * jax.random.normal(k[2], (d2, d1), jnp.float32),
        "b2": scale * jax.random.normal(k[3], (d2,), jnp.float32),
        "beta2": jnp.ones((d2,), jnp.float32),
        "w3": scale * jax.random.normal(k[4], (d3, d2), jnp.float32),
        "b3": scale * jax.random.normal(k[5], (d3,), jnp.float32),
    }


def mlp_reference(x, p):
    """Pure-JAX reference of the PyTorch forward."""
    h = x @ p["w1"].T + p["b1"]
    h = h * jax.nn.sigmoid(p["beta1"] * h)
    h = h @ p["w2"].T + p["b2"]
    h = h * jax.nn.sigmoid(p["beta2"] * h)
    return h @ p["w3"].T + p["b3"]


if __name__ == "__main__":
    layers = [16, 32, 32, 8]

    key = jax.random.PRNGKey(0)
    kp, kx1, kx2 = jax.random.split(key, 3)
    params = init_params(kp, layers)

    # Test 1: f32 MXU path, tiny batch (exercises pad-to-8 + slice), 1 step.
    x1 = jax.random.normal(kx1, (2, layers[0]), jnp.float32)
    out1 = jax.block_until_ready(mlp_forward(x1, params, use_bf16=False))
    ref1 = mlp_reference(x1, params)
    assert out1.shape == (2, layers[-1])
    assert jnp.allclose(out1, ref1, atol=1e-4, rtol=1e-4), "f32 mismatch"

    # Test 2: bf16 MXU path, multi-step grid with a ragged last block.
    x2 = jax.random.normal(kx2, (300, layers[0]), jnp.float32)
    out2 = jax.block_until_ready(mlp_forward(x2, params, block_b=128,
                                             use_bf16=True))
    ref2 = mlp_reference(x2, params)
    assert out2.shape == (300, layers[-1])
    assert jnp.allclose(out2, ref2, atol=2e-2, rtol=2e-2), "bf16 mismatch"

    print("KERNEL_OK")
</pallas_src>

<mosaic_0001>
module attributes {stable_mosaic.version = 11 : i64} {
  func.func @_mlp_kernel(%arg0: i32, %arg1: memref<1x128xf32, #tpu.memory_space<vmem>>, %arg2: memref<128x256xf32, #tpu.memory_space<vmem>>, %arg3: memref<1x256xf32, #tpu.memory_space<vmem>>, %arg4: memref<1x256xf32, #tpu.memory_space<vmem>>, %arg5: memref<256x256xf32, #tpu.memory_space<vmem>>, %arg6: memref<1x256xf32, #tpu.memory_space<vmem>>, %arg7: memref<1x256xf32, #tpu.memory_space<vmem>>, %arg8: memref<256x64xf32, #tpu.memory_space<vmem>>, %arg9: memref<1x64xf32, #tpu.memory_space<vmem>>, %arg10: memref<1x64xf32, #tpu.memory_space<vmem>>) attributes {dimension_semantics = [#tpu.dimension_semantics<parallel>], iteration_bounds = array<i64: 1>, scalar_prefetch = 0 : i64, scratch_operands = 0 : i64, tpu.core_type = #tpu.core_type<tc>, window_params = [{transform_indices = @transform_0, window_bounds = array<i64: 1, 128>}, {pipeline_mode = #tpu.pipeline_mode<synchronous>, transform_indices = @transform_1, window_bounds = array<i64: 128, 256>}, {pipeline_mode = #tpu.pipeline_mode<synchronous>, transform_indices = @transform_2, window_bounds = array<i64: 1, 256>}, {pipeline_mode = #tpu.pipeline_mode<synchronous>, transform_indices = @transform_3, window_bounds = array<i64: 1, 256>}, {pipeline_mode = #tpu.pipeline_mode<synchronous>, transform_indices = @transform_4, window_bounds = array<i64: 256, 256>}, {pipeline_mode = #tpu.pipeline_mode<synchronous>, transform_indices = @transform_5, window_bounds = array<i64: 1, 256>}, {pipeline_mode = #tpu.pipeline_mode<synchronous>, transform_indices = @transform_6, window_bounds = array<i64: 1, 256>}, {pipeline_mode = #tpu.pipeline_mode<synchronous>, transform_indices = @transform_7, window_bounds = array<i64: 256, 64>}, {pipeline_mode = #tpu.pipeline_mode<synchronous>, transform_indices = @transform_8, window_bounds = array<i64: 1, 64>}, {transform_indices = @transform_9, window_bounds = array<i64: 1, 64>}]} {
    %c0 = arith.constant 0 : index
    %c0_0 = arith.constant 0 : index
    %0 = vector.load %arg1[%c0, %c0_0] : memref<1x128xf32, #tpu.memory_space<vmem>>, vector<1x128xf32>
    %c0_1 = arith.constant 0 : index
    %c0_2 = arith.constant 0 : index
    %1 = vector.load %arg2[%c0_1, %c0_2] : memref<128x256xf32, #tpu.memory_space<vmem>>, vector<128x256xf32>
    %cst = arith.constant dense<0.000000e+00> : vector<1x256xf32>
    %2 = tpu.matmul %0, %1, %cst {dimension_numbers = #tpu.dot_dimension_numbers<[1], [0], [0], [1], [0, 0, 1, 1], [], []>} : vector<1x128xf32>, vector<128x256xf32>, vector<1x256xf32> -> vector<1x256xf32>
    %c0_3 = arith.constant 0 : index
    %c0_4 = arith.constant 0 : index
    %3 = vector.load %arg3[%c0_3, %c0_4] : memref<1x256xf32, #tpu.memory_space<vmem>>, vector<1x256xf32>
    %4 = arith.addf %2, %3 : vector<1x256xf32>
    %c0_5 = arith.constant 0 : index
    %c0_6 = arith.constant 0 : index
    %5 = vector.load %arg4[%c0_5, %c0_6] : memref<1x256xf32, #tpu.memory_space<vmem>>, vector<1x256xf32>
    %6 = arith.mulf %4, %5 : vector<1x256xf32>
    %7 = math.tanh %6 : vector<1x256xf32>
    %cst_7 = arith.constant 1.000000e+00 : f32
    %8 = vector.broadcast %cst_7 : f32 to vector<1x256xf32>
    %9 = arith.addf %7, %8 : vector<1x256xf32>
    %cst_8 = arith.constant 5.000000e-01 : f32
    %10 = vector.broadcast %cst_8 : f32 to vector<1x256xf32>
    %11 = arith.mulf %10, %9 : vector<1x256xf32>
    %12 = arith.mulf %4, %11 : vector<1x256xf32>
    %c0_9 = arith.constant 0 : index
    %c0_10 = arith.constant 0 : index
    %13 = vector.load %arg5[%c0_9, %c0_10] : memref<256x256xf32, #tpu.memory_space<vmem>>, vector<256x256xf32>
    %cst_11 = arith.constant dense<0.000000e+00> : vector<1x256xf32>
    %14 = tpu.matmul %12, %13, %cst_11 {dimension_numbers = #tpu.dot_dimension_numbers<[1], [0], [0], [1], [0, 0, 1, 1], [], []>} : vector<1x256xf32>, vector<256x256xf32>, vector<1x256xf32> -> vector<1x256xf32>
    %c0_12 = arith.constant 0 : index
    %c0_13 = arith.constant 0 : index
    %15 = vector.load %arg6[%c0_12, %c0_13] : memref<1x256xf32, #tpu.memory_space<vmem>>, vector<1x256xf32>
    %16 = arith.addf %14, %15 : vector<1x256xf32>
    %c0_14 = arith.constant 0 : index
    %c0_15 = arith.constant 0 : index
    %17 = vector.load %arg7[%c0_14, %c0_15] : memref<1x256xf32, #tpu.memory_space<vmem>>, vector<1x256xf32>
    %18 = arith.mulf %16, %17 : vector<1x256xf32>
    %19 = math.tanh %18 : vector<1x256xf32>
    %cst_16 = arith.constant 1.000000e+00 : f32
    %20 = vector.broadcast %cst_16 : f32 to vector<1x256xf32>
    %21 = arith.addf %19, %20 : vector<1x256xf32>
    %cst_17 = arith.constant 5.000000e-01 : f32
    %22 = vector.broadcast %cst_17 : f32 to vector<1x256xf32>
    %23 = arith.mulf %22, %21 : vector<1x256xf32>
    %24 = arith.mulf %16, %23 : vector<1x256xf32>
    %c0_18 = arith.constant 0 : index
    %c0_19 = arith.constant 0 : index
    %25 = vector.load %arg8[%c0_18, %c0_19] : memref<256x64xf32, #tpu.memory_space<vmem>>, vector<256x64xf32>
    %cst_20 = arith.constant dense<0.000000e+00> : vector<1x64xf32>
    %26 = tpu.matmul %24, %25, %cst_20 {dimension_numbers = #tpu.dot_dimension_numbers<[1], [0], [0], [1], [0, 0, 1, 1], [], []>} : vector<1x256xf32>, vector<256x64xf32>, vector<1x64xf32> -> vector<1x64xf32>
    %c0_21 = arith.constant 0 : index
    %c0_22 = arith.constant 0 : index
    %27 = vector.load %arg9[%c0_21, %c0_22] : memref<1x64xf32, #tpu.memory_space<vmem>>, vector<1x64xf32>
    %28 = arith.addf %26, %27 : vector<1x64xf32>
    %c0_23 = arith.constant 0 : index
    %c0_24 = arith.constant 0 : index
    %29 = vector.load %arg10[%c0_23, %c0_24] : memref<1x64xf32, #tpu.memory_space<vmem>>, vector<1x64xf32>
    tpu.vector_store %arg10[%c0_23, %c0_24], %28 {strides = array<i32>} : memref<1x64xf32, #tpu.memory_space<vmem>>, vector<1x64xf32>,
    return
  }
  func.func @transform_0(%arg0: i32) -> (i32, i32) {
    %c0_i32 = arith.constant 0 : i32
    %c0_i32_0 = arith.constant 0 : i32
    return %arg0, %c0_i32 : i32, i32
  }
  func.func @transform_1(%arg0: i32) -> (i32, i32) {
    %c0_i32 = arith.constant 0 : i32
    %c0_i32_0 = arith.constant 0 : i32
    %c0_i32_1 = arith.constant 0 : i32
    return %c0_i32, %c0_i32_0 : i32, i32
  }
  func.func @transform_2(%arg0: i32) -> (i32, i32) {
    %c0_i32 = arith.constant 0 : i32
    %c0_i32_0 = arith.constant 0 : i32
    %c0_i32_1 = arith.constant 0 : i32
    return %c0_i32, %c0_i32_0 : i32, i32
  }
  func.func @transform_3(%arg0: i32) -> (i32, i32) {
    %c0_i32 = arith.constant 0 : i32
    %c0_i32_0 = arith.constant 0 : i32
    %c0_i32_1 = arith.constant 0 : i32
    return %c0_i32, %c0_i32_0 : i32, i32
  }
  func.func @transform_4(%arg0: i32) -> (i32, i32) {
    %c0_i32 = arith.constant 0 : i32
    %c0_i32_0 = arith.constant 0 : i32
    %c0_i32_1 = arith.constant 0 : i32
    return %c0_i32, %c0_i32_0 : i32, i32
  }
  func.func @transform_5(%arg0: i32) -> (i32, i32) {
    %c0_i32 = arith.constant 0 : i32
    %c0_i32_0 = arith.constant 0 : i32
    %c0_i32_1 = arith.constant 0 : i32
    return %c0_i32, %c0_i32_0 : i32, i32
  }
  func.func @transform_6(%arg0: i32) -> (i32, i32) {
    %c0_i32 = arith.constant 0 : i32
    %c0_i32_0 = arith.constant 0 : i32
    %c0_i32_1 = arith.constant 0 : i32
    return %c0_i32, %c0_i32_0 : i32, i32
  }
  func.func @transform_7(%arg0: i32) -> (i32, i32) {
    %c0_i32 = arith.constant 0 : i32
    %c0_i32_0 = arith.constant 0 : i32
    %c0_i32_1 = arith.constant 0 : i32
    return %c0_i32, %c0_i32_0 : i32, i32
  }
  func.func @transform_8(%arg0: i32) -> (i32, i32) {
    %c0_i32 = arith.constant 0 : i32
    %c0_i32_0 = arith.constant 0 : i32
    %c0_i32_1 = arith.constant 0 : i32
    return %c0_i32, %c0_i32_0 : i32, i32
  }
  func.func @transform_9(%arg0: i32) -> (i32, i32) {
    %c0_i32 = arith.constant 0 : i32
    %c0_i32_0 = arith.constant 0 : i32
    return %arg0, %c0_i32 : i32, i32
  }
}

</mosaic_0001>

<bundles_post_ra>
// kernel: tpu_custom_call.1
= control target key start
LH: loop header
LB: loop body
LE: loop exit
PB: predicated region body
PF: predicated region fallthrough
CT: control target
= control target key end

     0   :  { %14 = vsyncpa [#allocation3], 0  ;;  %s736_s0 = inlined_call_operand.vmem [shape: f32[1,128], index: 0, kind: input, shape index: {}]   ;;  %s737_s1 = inlined_call_operand.vmem [shape: f32[128,256], index: 1, kind: input, shape index: {}]   ;;  %s738_s2 = inlined_call_operand.vmem [shape: f32[1,256], index: 2, kind: input, shape index: {}]   ;;  %s739_s3 = inlined_call_operand.vmem [shape: f32[1,256], index: 3, kind: input, shape index: {}]   ;;  %s740_s4 = inlined_call_operand.hbm [shape: f32[256,256], index: 4, kind: input, shape index: {}]   ;;  %s741_s5 = inlined_call_operand.vmem [shape: f32[1,256], index: 5, kind: input, shape index: {}]   ;;  %s742_s6 = inlined_call_operand.vmem [shape: f32[1,256], index: 6, kind: input, shape index: {}]   ;;  %s743_s7 = inlined_call_operand.vmem [shape: f32[256,64], index: 7, kind: input, shape index: {}]   ;;  %s744_s8 = inlined_call_operand.vmem [shape: f32[1,64], index: 8, kind: input, shape index: {}]   ;;  %s745_s9 = inlined_call_operand.hbm [shape: f32[1,64], index: 9, kind: output, shape index: {}]  }
   0x1   :  { %15 = vsyncpa [#allocation4], 0  ;;  %s28_s11 = sshll.u32 %s740_s4, 4  ;;  %s466_s12 = smov [#allocation2]   ;;  %s29_s11 = int_to_ptr.hbm [resolvable:$true] %s28_s11 }
   0x2   :  { %s30_s13 = sshll.u32 %s466_s12, 4  ;;  %s467_s14 = smov 256   ;;  %s31_s13 = int_to_ptr.vmem [resolvable:$true] %s30_s13 }
   0x3   :  { %s468_s15 = smov 16  }
   0x4   :  { %36 = dma.hbm_to_vmem [thread:$0]  %s29_s11, 8192, %s31_s13, [#allocation3], %s467_s14, %s467_s14, %s468_s15  }
   0x5   :  { %462 = dma.done.wait [#allocation3], 8192  }
   0x6   :  { %463 = vsyncadd [#allocation3], 4294959104  ;;  %v80_v0 = vld [vmem:[%s737_s1 + $0xf0] sm:$0xff]  ;;  %v81_v1 = vld [vmem:[%s737_s1 + $0xf8] sm:$0xff]  ;;  %vm383_vm0 = vcmask 516096  }
   0x7   :  { %v78_v2 = vld [vmem:[%s737_s1 + $0xe0] sm:$0xff]  ;;  %88 = vmatpush.msra.mxu0 %v80_v0  ;;  %108 = vmatpush.msra.mxu1 %v81_v1  ;;  %v79_v3 = vld [vmem:[%s737_s1 + $0xe8] sm:$0xff]  ;;  %v76_v4 = vld [vmem:[%s737_s1 + $0xd0] sm:$0xff] }
   0x8   :  { %v77_v5 = vld [vmem:[%s737_s1 + $0xd8] sm:$0xff]  ;;  %v74_v6 = vld [vmem:[%s737_s1 + $0xc0] sm:$0xff]  ;;  %v75_v7 = vld [vmem:[%s737_s1 + $0xc8] sm:$0xff] }
   0x9   :  { %89 = vmatpush.msra.mxu0 %v78_v2  ;;  %109 = vmatpush.msra.mxu1 %v79_v3  ;;  %v72_v8 = vld [vmem:[%s737_s1 + $0xb0] sm:$0xff]  ;;  %v73_v9 = vld [vmem:[%s737_s1 + $0xb8] sm:$0xff]  ;;  %v70_v10 = vld [vmem:[%s737_s1 + $0xa0] sm:$0xff] }
   0xa   :  { %v71_v11 = vld [vmem:[%s737_s1 + $0xa8] sm:$0xff]  ;;  %v68_v12 = vld [vmem:[%s737_s1 + $0x90] sm:$0xff]  ;;  %v69_v13 = vld [vmem:[%s737_s1 + $0x98] sm:$0xff] }
   0xb   :  { %90 = vmatpush.msra.mxu0 %v76_v4  ;;  %110 = vmatpush.msra.mxu1 %v77_v5  ;;  %v66_v14 = vld [vmem:[%s737_s1 + $0x80] sm:$0xff]  ;;  %v174_v15 = vld [vmem:[#allocation2 + $0xf0] sm:$0xff]  ;;  %v67_v17 = vld [vmem:[%s737_s1 + $0x88] sm:$0xff] }
   0xc   :  { %v206_v16 = vld [vmem:[#allocation2 + $0x1f0] sm:$0xff]  ;;  %214 = vmatpush.msra.mxu2 %v174_v15  ;;  %v172_v18 = vld [vmem:[#allocation2 + $0xe0] sm:$0xff]  ;;  %v65_v22 = vld [vmem:[%s737_s1 + $0x78] sm:$0xff] }
   0xd   :  { %91 = vmatpush.msra.mxu0 %v74_v6  ;;  %111 = vmatpush.msra.mxu1 %v75_v7  ;;  %v204_v19 = vld [vmem:[#allocation2 + $0x1e0] sm:$0xff]  ;;  %v170_v20 = vld [vmem:[#allocation2 + $0xd0] sm:$0xff]  ;;  %v63_v27 = vld [vmem:[%s737_s1 + $0x68] sm:$0xff] }
   0xe   :  { %234 = vmatpush.msra.mxu3 %v206_v16  ;;  %v64_v21 = vld [vmem:[%s737_s1 + $0x70] sm:$0xff]  ;;  %215 = vmatpush.msra.mxu2 %v172_v18  ;;  %v168_v24 = vld [vmem:[#allocation2 + $0xc0] sm:$0xff]  ;;  %v61_v31 = vld [vmem:[%s737_s1 + $0x58] sm:$0xff] }
   0xf   :  { %92 = vmatpush.msra.mxu0 %v72_v8  ;;  %112 = vmatpush.msra.mxu1 %v73_v9  ;;  %v202_v23 = vld [vmem:[#allocation2 + $0x1d0] sm:$0xff]  ;;  %v200_v25 = vld [vmem:[#allocation2 + $0x1c0] sm:$0xff]  ;;  %v59_v35 = vld [vmem:[%s737_s1 + $0x48] sm:$0xff] }
  0x10   :  { %235 = vmatpush.msra.mxu3 %v204_v19  ;;  %v62_v26 = vld [vmem:[%s737_s1 + $0x60] sm:$0xff]  ;;  %216 = vmatpush.msra.mxu2 %v170_v20  ;;  %v166_v28 = vld [vmem:[#allocation2 + $0xb0] sm:$0xff]  ;;  %v57_v39 = vld [vmem:[%s737_s1 + $0x38] sm:$0xff] }
  0x11   :  { %93 = vmatpush.msra.mxu0 %v70_v10  ;;  %113 = vmatpush.msra.mxu1 %v71_v11  ;;  %v198_v29 = vld [vmem:[#allocation2 + $0x1b0] sm:$0xff]  ;;  %v164_v32 = vld [vmem:[#allocation2 + $0xa0] sm:$0xff]  ;;  %v55_v41 = vld [vmem:[%s737_s1 + $0x28] sm:$0xff] }
  0x12   :  { %236 = vmatpush.msra.mxu3 %v202_v23  ;;  %v60_v30 = vld [vmem:[%s737_s1 + $0x50] sm:$0xff]  ;;  %217 = vmatpush.msra.mxu2 %v168_v24  ;;  %v196_v33 = vld [vmem:[#allocation2 + $0x1a0] sm:$0xff]  ;;  %v53_v43 = vld [vmem:[%s737_s1 + $0x18] sm:$0xff] }
  0x13   :  { %94 = vmatpush.msra.mxu0 %v68_v12  ;;  %114 = vmatpush.msra.mxu1 %v69_v13  ;;  %v58_v34 = vld [vmem:[%s737_s1 + $0x40] sm:$0xff]  ;;  %v162_v36 = vld [vmem:[#allocation2 + $0x90] sm:$0xff]  ;;  %v51_v45 = vld [vmem:[%s737_s1 + $0x8] sm:$0xff] }
  0x14   :  { %237 = vmatpush.msra.mxu3 %v200_v25  ;;  %218 = vmatpush.msra.mxu2 %v166_v28  ;;  %v194_v37 = vld [vmem:[#allocation2 + $0x190] sm:$0xff]  ;;  %v54_v40 = vld [vmem:[%s737_s1 + $0x20] sm:$0xff]  ;;  %v175_v47 = vld [vmem:[#allocation2 + $0xf8] sm:$0xff] }
  0x15   :  { %95 = vmatpush.msra.mxu0 %v66_v14  ;;  %115 = vmatpush.msra.mxu1 %v67_v17  ;;  %v56_v38 = vld [vmem:[%s737_s1 + $0x30] sm:$0xff]  ;;  %v50_v44 = vld [vmem:[%s737_s1] sm:$0xff]  ;;  %v207_v48 = vld [vmem:[#allocation2 + $0x1f8] sm:$0xff] }
  0x16   :  { %238 = vmatpush.msra.mxu3 %v198_v29  ;;  %219 = vmatpush.msra.mxu2 %v164_v32  ;;  %v52_v42 = vld [vmem:[%s737_s1 + $0x10] sm:$0xff]  ;;  %v49_v46 = vld [vmem:[%s736_s0] sm:$0x1]  ;;  %v173_v49 = vld [vmem:[#allocation2 + $0xe8] sm:$0xff] }
  0x17   :  { %96 = vmatpush.msra.mxu0 %v64_v21  ;;  %116 = vmatpush.msra.mxu1 %v65_v22  ;;  %v205_v50 = vld [vmem:[#allocation2 + $0x1e8] sm:$0xff]  ;;  %v171_v51 = vld [vmem:[#allocation2 + $0xd8] sm:$0xff]  ;;  %v160_v61 = vld [vmem:[#allocation2 + $0x80] sm:$0xff] }
  0x18   :  { %239 = vmatpush.msra.mxu3 %v196_v33  ;;  %220 = vmatpush.msra.mxu2 %v162_v36  ;;  %v203_v52 = vld [vmem:[#allocation2 + $0x1d8] sm:$0xff]  ;;  %v169_v53 = vld [vmem:[#allocation2 + $0xc8] sm:$0xff]  ;;  %v192_v62 = vld [vmem:[#allocation2 + $0x180] sm:$0xff] }
  0x19   :  { %97 = vmatpush.msra.mxu0 %v62_v26  ;;  %117 = vmatpush.msra.mxu1 %v63_v27  ;;  %v201_v54 = vld [vmem:[#allocation2 + $0x1c8] sm:$0xff]  ;;  %v167_v55 = vld [vmem:[#allocation2 + $0xb8] sm:$0xff]  ;;  %v158_v1 = vld [vmem:[#allocation2 + $0x70] sm:$0xff] }
  0x1a   :  { %240 = vmatpush.msra.mxu3 %v194_v37  ;;  %v199_v56 = vld [vmem:[#allocation2 + $0x1b8] sm:$0xff]  ;;  %v165_v57 = vld [vmem:[#allocation2 + $0xa8] sm:$0xff]  ;;  %221 = vmatpush.msra.mxu2 %v160_v61  ;;  %v190_v2 = vld [vmem:[#allocation2 + $0x170] sm:$0xff] }
  0x1b   :  { %98 = vmatpush.msra.mxu0 %v60_v30  ;;  %118 = vmatpush.msra.mxu1 %v61_v31  ;;  %v197_v58 = vld [vmem:[#allocation2 + $0x1a8] sm:$0xff]  ;;  %v163_v59 = vld [vmem:[#allocation2 + $0x98] sm:$0xff]  ;;  %v156_v5 = vld [vmem:[#allocation2 + $0x60] sm:$0xff] }
  0x1c   :  { %v195_v60 = vld [vmem:[#allocation2 + $0x198] sm:$0xff]  ;;  %v161_v63 = vld [vmem:[#allocation2 + $0x88] sm:$0xff]  ;;  %241 = vmatpush.msra.mxu3 %v192_v62  ;;  %222 = vmatpush.msra.mxu2 %v158_v1  ;;  %v188_v6 = vld [vmem:[#allocation2 + $0x160] sm:$0xff] }
  0x1d   :  { %99 = vmatpush.msra.mxu0 %v58_v34  ;;  %119 = vmatpush.msra.mxu1 %v59_v35  ;;  %v193_v0 = vld [vmem:[#allocation2 + $0x188] sm:$0xff]  ;;  %v159_v3 = vld [vmem:[#allocation2 + $0x78] sm:$0xff]  ;;  %v154_v9 = vld [vmem:[#allocation2 + $0x50] sm:$0xff] }
  0x1e   :  { %242 = vmatpush.msra.mxu3 %v190_v2  ;;  %v191_v4 = vld [vmem:[#allocation2 + $0x178] sm:$0xff]  ;;  %v157_v7 = vld [vmem:[#allocation2 + $0x68] sm:$0xff]  ;;  %223 = vmatpush.msra.mxu2 %v156_v5  ;;  %v186_v10 = vld [vmem:[#allocation2 + $0x150] sm:$0xff] }
  0x1f   :  { %100 = vmatpush.msra.mxu0 %v56_v38  ;;  %120 = vmatpush.msra.mxu1 %v57_v39  ;;  %v189_v8 = vld [vmem:[#allocation2 + $0x168] sm:$0xff]  ;;  %v155_v11 = vld [vmem:[#allocation2 + $0x58] sm:$0xff]  ;;  %v152_v13 = vld [vmem:[#allocation2 + $0x40] sm:$0xff] }
  0x20   :  { %243 = vmatpush.msra.mxu3 %v188_v6  ;;  %v187_v12 = vld [vmem:[#allocation2 + $0x158] sm:$0xff]  ;;  %224 = vmatpush.msra.mxu2 %v154_v9  ;;  %v184_v14 = vld [vmem:[#allocation2 + $0x140] sm:$0xff]  ;;  %v153_v15 = vld [vmem:[#allocation2 + $0x48] sm:$0xff] }
  0x21   :  { %101 = vmatpush.msra.mxu0 %v54_v40  ;;  %121 = vmatpush.msra.mxu1 %v55_v41  ;;  %v185_v16 = vld [vmem:[#allocation2 + $0x148] sm:$0xff]  ;;  %v150_v17 = vld [vmem:[#allocation2 + $0x30] sm:$0xff]  ;;  %v151_v19 = vld [vmem:[#allocation2 + $0x38] sm:$0xff] }
  0x22   :  { %244 = vmatpush.msra.mxu3 %v186_v10  ;;  %v182_v18 = vld [vmem:[#allocation2 + $0x130] sm:$0xff]  ;;  %225 = vmatpush.msra.mxu2 %v152_v13  ;;  %v183_v20 = vld [vmem:[#allocation2 + $0x138] sm:$0xff]  ;;  %v148_v21 = vld [vmem:[#allocation2 + $0x20] sm:$0xff] }
  0x23   :  { %102 = vmatpush.msra.mxu0 %v52_v42  ;;  %122 = vmatpush.msra.mxu1 %v53_v43  ;;  %v180_v22 = vld [vmem:[#allocation2 + $0x120] sm:$0xff]  ;;  %v149_v23 = vld [vmem:[#allocation2 + $0x28] sm:$0xff]  ;;  %v146_v25 = vld [vmem:[#allocation2 + $0x10] sm:$0xff] }
  0x24   :  { %245 = vmatpush.msra.mxu3 %v184_v14  ;;  %226 = vmatpush.msra.mxu2 %v150_v17  ;;  %v181_v24 = vld [vmem:[#allocation2 + $0x128] sm:$0xff]  ;;  %v178_v26 = vld [vmem:[#allocation2 + $0x110] sm:$0xff]  ;;  %v147_v27 = vld [vmem:[#allocation2 + $0x18] sm:$0xff] }
  0x25   :  { %103 = vmatpush.msra.mxu0 %v50_v44  ;;  %123 = vmatpush.msra.mxu1 %v51_v45  ;;  %v179_v28 = vld [vmem:[#allocation2 + $0x118] sm:$0xff]  ;;  %v144_v29 = vld [vmem:[#allocation2] sm:$0xff]  ;;  %v145_v31 = vld [vmem:[#allocation2 + $0x8] sm:$0xff] }
  0x26   :  { %104 = vmatmul.f32.vlgmr.msra.gmra.mxu0 %v49_v46  ;;  %124 = vmatmul.f32.vlgmr.msra.gmra.mxu1 %v49_v46  ;;  %v176_v30 = vld [vmem:[#allocation2 + $0x100] sm:$0xff]  ;;  %v177_v32 = vld [vmem:[#allocation2 + $0x108] sm:$0xff]  ;;  %v341_v33 = vld [vmem:[%s743_s7 + $0xf8] sm:$0xff] }
  0x27   :  { %254 = vmatpush.msrb.mxu0 %v175_v47  ;;  %274 = vmatpush.msrb.mxu1 %v207_v48  ;;  %v340_v34 = vld [vmem:[%s743_s7 + $0xf0] sm:$0xff]  ;;  %v325_v35 = vld [vmem:[%s743_s7 + $0x78] sm:$0xff]  ;;  %v339_v37 = vld [vmem:[%s743_s7 + $0xe8] sm:$0xff] }
  0x28   :  { %246 = vmatpush.msra.mxu3 %v182_v18  ;;  %227 = vmatpush.msra.mxu2 %v148_v21  ;;  %v324_v36 = vld [vmem:[%s743_s7 + $0x70] sm:$0xff]  ;;  %v323_v38 = vld [vmem:[%s743_s7 + $0x68] sm:$0xff]  ;;  %v338_v39 = vld [vmem:[%s743_s7 + $0xe0] sm:$0xff] }
  0x29   :  { %255 = vmatpush.msrb.mxu0 %v173_v49  ;;  %275 = vmatpush.msrb.mxu1 %v205_v50  ;;  %v337_v40 = vld [vmem:[%s743_s7 + $0xd8] sm:$0xff]  ;;  %v82_v41 = vld [vmem:[%s738_s2] sm:$0x3]  ;;  %v336_v42 = vld [vmem:[%s743_s7 + $0xd0] sm:$0xff] }
  0x2a   :  { %247 = vmatpush.msra.mxu3 %v180_v22  ;;  %228 = vmatpush.msra.mxu2 %v146_v25  ;;  %v128_v43 = vld [vmem:[%s739_s3] sm:$0x3]  ;;  %v84_v44 = vperm.slane %v82_v41, 0  ;;  %v85_v45 = vperm.slane %v82_v41, 1  ;;  %v320_v2 = vld [vmem:[%s743_s7 + $0x50] sm:$0xff]  ;;  %s392_s3 = sshll.u32 %s745_s9, 4  ;;  %s393_s3 = int_to_ptr.hbm [resolvable:$true] %s392_s3 }
  0x2b   :  { %256 = vmatpush.msrb.mxu0 %v171_v51  ;;  %276 = vmatpush.msrb.mxu1 %v203_v52  ;;  %v130_v46 = vperm.slane %v128_v43, 0  ;;  %v131_v47 = vperm.slane %v128_v43, 1  ;;  %v322_v62 = vld [vmem:[%s743_s7 + $0x60] sm:$0xff]  ;;  %v332_v5 = vld [vmem:[%s743_s7 + $0xb0] sm:$0xff] }
  0x2c   :  { %248 = vmatpush.msra.mxu3 %v178_v26  ;;  %229 = vmatpush.msra.mxu2 %v144_v29  ;;  %v334_v1 = vld [vmem:[%s743_s7 + $0xc0] sm:$0xff]  ;;  %v316_v10 = vld [vmem:[%s743_s7 + $0x30] sm:$0xff] }
  0x2d   :  { %257 = vmatpush.msrb.mxu0 %v169_v53  ;;  %277 = vmatpush.msrb.mxu1 %v201_v54  ;;  %v318_v6 = vld [vmem:[%s743_s7 + $0x40] sm:$0xff]  ;;  %v328_v13 = vld [vmem:[%s743_s7 + $0x90] sm:$0xff] }
  0x2e   :  { %249 = vmatpush.msra.mxu3 %v176_v30  ;;  %343 = vmatpush.msrb.mxu2 %v325_v35  ;;  %v330_v9 = vld [vmem:[%s743_s7 + $0xa0] sm:$0xff]  ;;  %v312_v18 = vld [vmem:[%s743_s7 + $0x10] sm:$0xff] }
  0x2f   :  { %258 = vmatpush.msrb.mxu0 %v167_v55  ;;  %278 = vmatpush.msrb.mxu1 %v199_v56  ;;  %v314_v14 = vld [vmem:[%s743_s7 + $0x20] sm:$0xff] }
  0x30   :  { %363 = vmatpush.msrb.mxu3 %v341_v33  ;;  %344 = vmatpush.msrb.mxu2 %v324_v36  ;;  %v326_v17 = vld [vmem:[%s743_s7 + $0x80] sm:$0xff] }
  0x31   :  { %259 = vmatpush.msrb.mxu0 %v165_v57  ;;  %279 = vmatpush.msrb.mxu1 %v197_v58  ;;  %v208_v21 = vld [vmem:[%s741_s5] sm:$0x3] }
  0x32   :  { %364 = vmatpush.msrb.mxu3 %v340_v34  ;;  %345 = vmatpush.msrb.mxu2 %v323_v38  ;;  %v211_v22 = vperm.slane %v208_v21, 1  ;;  %v210_v29 = vperm.slane %v208_v21, 0 }
  0x33   :  { %260 = vmatpush.msrb.mxu0 %v163_v59  ;;  %280 = vmatpush.msrb.mxu1 %v195_v60 }
  0x34   :  { %365 = vmatpush.msrb.mxu3 %v339_v37  ;;  %346 = vmatpush.msrb.mxu2 %v322_v62 }
  0x35   :  { %261 = vmatpush.msrb.mxu0 %v161_v63  ;;  %281 = vmatpush.msrb.mxu1 %v193_v0  ;;  %v335_v63 = vld [vmem:[%s743_s7 + $0xc8] sm:$0xff]  ;;  %v321_v0 = vld [vmem:[%s743_s7 + $0x58] sm:$0xff] }
  0x36   :  { %366 = vmatpush.msrb.mxu3 %v338_v39  ;;  %347 = vmatpush.msrb.mxu2 %v321_v0 }
  0x37   :  { %262 = vmatpush.msrb.mxu0 %v159_v3  ;;  %282 = vmatpush.msrb.mxu1 %v191_v4  ;;  %v333_v3 = vld [vmem:[%s743_s7 + $0xb8] sm:$0xff]  ;;  %v319_v4 = vld [vmem:[%s743_s7 + $0x48] sm:$0xff] }
  0x38   :  { %367 = vmatpush.msrb.mxu3 %v337_v40  ;;  %348 = vmatpush.msrb.mxu2 %v320_v2 }
  0x39   :  { %263 = vmatpush.msrb.mxu0 %v157_v7  ;;  %283 = vmatpush.msrb.mxu1 %v189_v8  ;;  %v331_v7 = vld [vmem:[%s743_s7 + $0xa8] sm:$0xff]  ;;  %v317_v8 = vld [vmem:[%s743_s7 + $0x38] sm:$0xff] }
  0x3a   :  { %368 = vmatpush.msrb.mxu3 %v336_v42  ;;  %349 = vmatpush.msrb.mxu2 %v319_v4 }
  0x3b   :  { %264 = vmatpush.msrb.mxu0 %v155_v11  ;;  %284 = vmatpush.msrb.mxu1 %v187_v12  ;;  %v329_v11 = vld [vmem:[%s743_s7 + $0x98] sm:$0xff]  ;;  %v315_v12 = vld [vmem:[%s743_s7 + $0x28] sm:$0xff] }
  0x3c   :  { %369 = vmatpush.msrb.mxu3 %v335_v63  ;;  %350 = vmatpush.msrb.mxu2 %v318_v6 }
  0x3d   :  { %265 = vmatpush.msrb.mxu0 %v153_v15  ;;  %285 = vmatpush.msrb.mxu1 %v185_v16  ;;  %v327_v15 = vld [vmem:[%s743_s7 + $0x88] sm:$0xff]  ;;  %v313_v16 = vld [vmem:[%s743_s7 + $0x18] sm:$0xff] }
  0x3e   :  { %370 = vmatpush.msrb.mxu3 %v334_v1  ;;  %351 = vmatpush.msrb.mxu2 %v317_v8 }
  0x3f   :  { %266 = vmatpush.msrb.mxu0 %v151_v19  ;;  %286 = vmatpush.msrb.mxu1 %v183_v20  ;;  %v311_v19 = vld [vmem:[%s743_s7 + $0x8] sm:$0xff]  ;;  %v310_v20 = vld [vmem:[%s743_s7] sm:$0xff]  ;;  %s469_s7 = smov [#allocation5]  }
  0x40   :  { %371 = vmatpush.msrb.mxu3 %v333_v3  ;;  %352 = vmatpush.msrb.mxu2 %v316_v10  ;;  %s390_s12 = sshll.u32 %s469_s7, 4  ;;  %s391_s12 = int_to_ptr.vmem [resolvable:$true] %s390_s12 }
  0x41   :  { %267 = vmatpush.msrb.mxu0 %v149_v23  ;;  %287 = vmatpush.msrb.mxu1 %v181_v24  ;;  %v294_v23 = vld [vmem:[%s742_s6] sm:$0x3] }
  0x42   :  { %372 = vmatpush.msrb.mxu3 %v332_v5  ;;  %353 = vmatpush.msrb.mxu2 %v315_v12  ;;  %v297_v26 = vperm.slane %v294_v23, 1  ;;  %v296_v33 = vperm.slane %v294_v23, 0 }
  0x43   :  { %268 = vmatpush.msrb.mxu0 %v147_v27  ;;  %288 = vmatpush.msrb.mxu1 %v179_v28 }
  0x44   :  { %373 = vmatpush.msrb.mxu3 %v331_v7  ;;  %354 = vmatpush.msrb.mxu2 %v314_v14 }
  0x45   :  { %269 = vmatpush.msrb.mxu0 %v145_v31  ;;  %289 = vmatpush.msrb.mxu1 %v177_v32 }
  0x46   :  { %374 = vmatpush.msrb.mxu3 %v330_v9  ;;  %355 = vmatpush.msrb.mxu2 %v313_v16 }
  0x48   :  { %375 = vmatpush.msrb.mxu3 %v329_v11  ;;  %356 = vmatpush.msrb.mxu2 %v312_v18 }
  0x4a   :  { %376 = vmatpush.msrb.mxu3 %v328_v13  ;;  %357 = vmatpush.msrb.mxu2 %v311_v19 }
  0x4c   :  { %377 = vmatpush.msrb.mxu3 %v327_v15  ;;  %358 = vmatpush.msrb.mxu2 %v310_v20 }
  0x4e   :  { %378 = vmatpush.msrb.mxu3 %v326_v17 }
  0xa3   :  { %v105_v48 = vpop.f32.mrf.mxu0  ;;  %v125_v49 = vpop.f32.mrf.mxu1 }
  0xa4   :  { %v106_v50 = vadd.f32 %v105_v48, %v84_v44  ;;  %v126_v51 = vadd.f32 %v125_v49, %v85_v45  ;;  %v342_v45 = vld [vmem:[%s744_s8] sm:$0x1] }
  0xa6   :  { %v134_v52 = vmul.f32 %v130_v46, %v106_v50  ;;  %v135_v53 = vmul.f32 %v131_v47, %v126_v51 }
  0xa8   :  { %406 = vtanh.f32 %v134_v52 }
  0xa9   :  { %408 = vtanh.f32 %v135_v53 }
  0xae   :  { %v407_v54 = vpop.eup %406 }
  0xaf   :  { %v409_v55 = vpop.eup %408  ;;  %v138_v56 = vadd.f32 1.0, %v407_v54 }
  0xb0   :  { %v139_v57 = vadd.f32 1.0, %v409_v55 }
  0xb1   :  { %v140_v58 = vmul.f32 0.5, %v138_v56 }
  0xb2   :  { %v141_v59 = vmul.f32 0.5, %v139_v57 }
  0xb3   :  { %v142_v60 = vmul.f32 %v140_v58, %v106_v50 }
  0xb4   :  { %v143_v61 = vmul.f32 %v141_v59, %v126_v51 }
  0xb5   :  { %230 = vmatmul.f32.vlgmr.msra.gmra.mxu2 %v142_v60  ;;  %270 = vmatmul.f32.vlgmr.msrb.gmra.mxu0 %v142_v60 }
  0xb6   :  { %250 = vmatmul.f32.vlgmr.msra.gmra.mxu3 %v143_v61  ;;  %290 = vmatmul.f32.vlgmr.msrb.gmra.mxu1 %v143_v61 }
 0x132   :  { %v271_v24 = vpop.f32.mrf.mxu0 }
 0x133   :  { %v272_v25 = vadd.f32 %v271_v24, %v211_v22  ;;  %v291_v27 = vpop.f32.mrf.mxu1 }
 0x135   :  { %v292_v28 = vadd.f32 %v291_v27, %v272_v25 }
 0x137   :  { %v301_v30 = vmul.f32 %v297_v26, %v292_v28 }
 0x138   :  { %v231_v31 = vpop.f32.mrf.mxu2 }
 0x139   :  { %410 = vtanh.f32 %v301_v30  ;;  %v232_v32 = vadd.f32 %v231_v31, %v210_v29  ;;  %v251_v34 = vpop.f32.mrf.mxu3 }
 0x13b   :  { %v252_v35 = vadd.f32 %v251_v34, %v232_v32 }
 0x13d   :  { %v300_v36 = vmul.f32 %v296_v33, %v252_v35 }
 0x13f   :  { %v411_v37 = vpop.eup %410  ;;  %412 = vtanh.f32 %v300_v36 }
 0x140   :  { %v305_v38 = vadd.f32 1.0, %v411_v37 }
 0x142   :  { %v307_v39 = vmul.f32 0.5, %v305_v38 }
 0x144   :  { %v309_v40 = vmul.f32 %v307_v39, %v292_v28 }
 0x145   :  { %v413_v41 = vpop.eup %412 }
 0x146   :  { %v304_v42 = vadd.f32 1.0, %v413_v41  ;;  %379 = vmatmul.f32.vlgmr.msrb.gmra.mxu3 %v309_v40 }
 0x148   :  { %v306_v43 = vmul.f32 0.5, %v304_v42 }
 0x14a   :  { %v308_v44 = vmul.f32 %v306_v43, %v252_v35 }
 0x14c   :  { %359 = vmatmul.f32.vlgmr.msrb.gmra.mxu2 %v308_v44 }
 0x1c9   :  { %v380_v48 = vpop.f32.mrf.mxu3 }
 0x1cf   :  { %v360_v46 = vpop.f32.mrf.mxu2 }
 0x1d0   :  { %v361_v47 = vadd.f32 %v360_v46, %v342_v45 }
 0x1d2   :  { %v381_v49 = vadd.f32 %v380_v48, %v361_v47 }
 0x1d4   :  { %384 = vst.msk [vmem:[#allocation5] sm:$0x1] %vm383_vm0, %v381_v49 }
 0x1d5   :  { %395 = dma.vmem_to_hbm [thread:$0]  %s391_s12, 16, %s393_s3, [#allocation4]  }
 0x1d6   :  { %464 = dma.done.wait [#allocation4], 16  }
 0x1d7   :  { %465 = vsyncadd [#allocation4], 4294967280 }
 0x1d8   :  { %400 = vsyncpa [#allocation3], 1 }
 0x1d9   :  { %401 = vsyncpa [#allocation4], 1 }

</bundles_post_ra>
